<compile_context>
chip_gen: v7x
topology: tpu7x:2x2x1
jax: 0.10.0
libtpu: 0.0.40
codegen_flags: <defaults>
</compile_context>

<pallas_src>
import math

import jax
import jax.numpy as jnp
from jax import lax
from jax.experimental import pallas as pl
from jax.experimental.pallas import tpu as pltpu


# ----------------------------- Pallas kernel -------------------------------

def _make_ddpm_loss_kernel(tb: int):
    """Kernel: one grid step = `tb` images; emits a (C, P) partial-sum slab."""

    def kernel(sa_ref, sb_ref, x_ref, n_ref, w1t_ref, bias_ref, w2t_ref,
               b2_ref, out_ref):
        blk = pl.program_id(0)
        C, P = x_ref.shape[1], x_ref.shape[2]

        def body(i, acc):
            b = blk * tb + i                        # global batch index
            x = x_ref[i].astype(jnp.float32)        # (C, P)  bf16 -> f32
            n = n_ref[i].astype(jnp.float32)        # (C, P)
            sa = sa_ref[b]                          # SMEM scalar
            sb = sb_ref[b]                          # SMEM scalar

            # add_noise: scalar * lane-dense tiles
            noisy = sa * x + sb * n                 # (C, P)

            # time/label-conditioned pointwise network (1x1 convs)
            h = jnp.dot(w1t_ref[...], noisy,
                        preferred_element_type=jnp.float32)    # (H, P)
            h = jnp.maximum(h + bias_ref[i], 0.0)   # fused (b1+temb+lemb), (H,1)
            est = jnp.dot(w2t_ref[...], h,
                          preferred_element_type=jnp.float32)  # (C, P)
            est = est + b2_ref[...]                 # (C, 1) broadcast

            diff = est - n
            return acc + diff * diff                # vector accumulator

        acc0 = jnp.zeros((C, P), jnp.float32)
        acc = lax.fori_loop(0, tb, body, acc0, unroll=True)
        out_ref[0] = acc                            # (C, P) partial-sum slab

    return kernel


def _choose_tb(B, C, P, itemsize):
    """Images per grid step: ~1 MiB of x+noise per step, but keep >=2 blocks
    (when B >= 2) so the 'parallel' grid axis can use both v7x TensorCores."""
    per_img = 2 * C * P * itemsize
    target = max(1, (1 << 20) // max(per_img, 1))
    cap = B // 2 if B >= 2 else B
    tb = max(1, min(B, target, cap))
    while B % tb != 0:
        tb -= 1
    return tb


def ddpm_loss_pallas(x_bcp, noise_bcp, sa, sb, bias_bh1, w1t, w2t, b2col):
    """x_bcp / noise_bcp: (B, C, P) bf16; returns scalar MSE loss (f32)."""
    B, C, P = x_bcp.shape
    H = w1t.shape[0]
    tb = _choose_tb(B, C, P, x_bcp.dtype.itemsize)
    nblk = B // tb

    kernel = _make_ddpm_loss_kernel(tb)
    smem_spec = pl.BlockSpec(memory_space=pltpu.MemorySpace.SMEM)

    partials = pl.pallas_call(
        kernel,
        out_shape=jax.ShapeDtypeStruct((nblk, C, P), jnp.float32),
        grid_spec=pltpu.PrefetchScalarGridSpec(
            num_scalar_prefetch=0,
            grid=(nblk,),
            in_specs=[
                smem_spec,                                       # sa (B,) scalars
                smem_spec,                                       # sb (B,) scalars
                pl.BlockSpec((tb, C, P), lambda b: (b, 0, 0)),   # x      (bf16)
                pl.BlockSpec((tb, C, P), lambda b: (b, 0, 0)),   # noise  (bf16)
                pl.BlockSpec((H, C), lambda b: (0, 0)),          # w1^T
                pl.BlockSpec((tb, H, 1), lambda b: (b, 0, 0)),   # fused bias col
                pl.BlockSpec((C, H), lambda b: (0, 0)),          # w2^T
                pl.BlockSpec((C, 1), lambda b: (0, 0)),          # b2 column
            ],
            out_specs=pl.BlockSpec((1, C, P), lambda b: (b, 0, 0)),
        ),
        compiler_params=pltpu.CompilerParams(
            dimension_semantics=("parallel",),       # blocks are independent
            vmem_limit_bytes=32 * 1024 * 1024,       # safe on v5e/v6e/v7x
        ),
    )(sa, sb, x_bcp, noise_bcp, w1t, bias_bh1, w2t, b2col)

    return jnp.sum(partials) / (B * C * P)


# ------------------------------ JAX glue ------------------------------------

def make_variance_scheduler(beta_start=1e-4, beta_end=0.02, num_steps=1000):
    betas = jnp.linspace(beta_start, beta_end, num_steps, dtype=jnp.float32)
    alphas = 1.0 - betas
    alpha_cumprod = jnp.cumprod(alphas)
    return {
        "betas": betas,
        "alphas": alphas,
        "alpha_cumprod": alpha_cumprod,
        "sqrt_alphas_cumprod": jnp.sqrt(alpha_cumprod),
        "sqrt_one_minus_alphas_cumprod": jnp.sqrt(1.0 - alpha_cumprod),
        "num_steps": num_steps,
    }


def sinusoidal_time_embedding(t, dim):
    half = dim // 2
    freqs = jnp.exp(-math.log(10000.0) * jnp.arange(half, dtype=jnp.float32) / half)
    args = t.astype(jnp.float32)[:, None] * freqs[None, :]
    return jnp.concatenate([jnp.sin(args), jnp.cos(args)], axis=-1)


def ddpm_forward(x_nchw, label, sched, params, key):
    """Mirrors DDPM.forward: noise injection + network + MSE loss."""
    B, C, H, W = x_nchw.shape
    P = H * W
    k_t, k_n = jax.random.split(key)

    # randomness stays in glue (t ~ randint, noise ~ N(0,1))
    t = jax.random.randint(k_t, (B,), 0, sched["num_steps"])
    noise_nchw = jax.random.normal(k_n, x_nchw.shape, dtype=jnp.float32)

    # channels-first lane-dense layout: NCHW -> (B, C, H*W) is a pure reshape
    x_bcp = x_nchw.reshape(B, C, P)
    noise_bcp = noise_nchw.reshape(B, C, P)

    # bf16 streaming; the kernel upcasts to f32 before the noise mix / MSE
    x_stream = x_bcp.astype(jnp.bfloat16)
    n_stream = noise_bcp.astype(jnp.bfloat16)

    sa = sched["sqrt_alphas_cumprod"][t]                 # (B,)
    sb = sched["sqrt_one_minus_alphas_cumprod"][t]       # (B,)

    hid = params["w1"].shape[1]
    temb = sinusoidal_time_embedding(t, hid)             # (B, hid)
    lemb = params["label_emb"][label]                    # (B, hid) gather (glue)
    bias_bh = params["b1"] + temb + lemb                 # fused additive term
    bias_bh1 = bias_bh[:, :, None]                       # (B, hid, 1) column

    w1t = params["w1"].T                                 # (hid, C)
    w2t = params["w2"].T                                 # (C, hid)
    b2col = params["b2"].reshape(C, 1)                   # (C, 1)

    loss = ddpm_loss_pallas(x_stream, n_stream, sa, sb, bias_bh1,
                            w1t, w2t, b2col)
    return loss, (t, x_stream, n_stream, sa, sb, bias_bh)


def reference_loss(x_stream, n_stream, sa, sb, bias_bh, params):
    """Pure-JAX reference on the same (bf16-quantized) streamed inputs."""
    x = x_stream.astype(jnp.float32)                     # (B, C, P)
    n = n_stream.astype(jnp.float32)
    noisy = sa[:, None, None] * x + sb[:, None, None] * n
    h = jnp.einsum("bcp,ch->bhp", noisy, params["w1"],
                   precision=jax.lax.Precision.HIGHEST)
    h = jnp.maximum(h + bias_bh[:, :, None], 0.0)
    est = jnp.einsum("bhp,hc->bcp", h, params["w2"],
                     precision=jax.lax.Precision.HIGHEST)
    est = est + params["b2"].reshape(1, -1, 1)
    return jnp.mean((est - n) ** 2)


# ------------------------------- main ---------------------------------------

if __name__ == "__main__":
    B, C, H, W = 2, 4, 16, 16
    HID = 32
    NUM_CLASSES = 10

    root = jax.random.PRNGKey(0)
    k_x, k_lbl, k_w1, k_w2, k_emb, k_fwd = jax.random.split(root, 6)

    x = jax.random.normal(k_x, (B, C, H, W), dtype=jnp.float32)
    label = jax.random.randint(k_lbl, (B,), 0, NUM_CLASSES)

    # deterministic synthetic network parameters
    params = {
        "w1": jax.random.normal(k_w1, (C, HID), dtype=jnp.float32) * 0.1,
        "b1": jnp.zeros((1, HID), dtype=jnp.float32),
        "w2": jax.random.normal(k_w2, (HID, C), dtype=jnp.float32) * 0.1,
        "b2": jnp.zeros((1, C), dtype=jnp.float32),
        "label_emb": jax.random.normal(k_emb, (NUM_CLASSES, HID),
                                       dtype=jnp.float32) * 0.1,
    }

    sched = make_variance_scheduler()

    loss, (t, x_stream, n_stream, sa, sb, bias_bh) = ddpm_forward(
        x, label, sched, params, k_fwd)
    loss = jax.block_until_ready(loss)

    ref = reference_loss(x_stream, n_stream, sa, sb, bias_bh, params)
    # MXU f32 matmul precision differs slightly from XLA HIGHEST; loss is O(1).
    assert jnp.allclose(loss, ref, rtol=5e-3, atol=1e-5), (loss, ref)

    # TODO(synk): the real injected UNet (self.network) is external to DDPM;
    # a small time/label-conditioned pointwise network stands in for it here.
    print("KERNEL_OK")
</pallas_src>

<mosaic_0001>
module attributes {stable_mosaic.version = 11 : i64} {
  func.func @kernel(%arg0: i32, %arg1: memref<2xf32, #tpu.memory_space<smem>>, %arg2: memref<2xf32, #tpu.memory_space<smem>>, %arg3: memref<1x4x256xbf16, #tpu.memory_space<vmem>>, %arg4: memref<1x4x256xbf16, #tpu.memory_space<vmem>>, %arg5: memref<32x4xf32, #tpu.memory_space<vmem>>, %arg6: memref<1x32x1xf32, #tpu.memory_space<vmem>>, %arg7: memref<4x32xf32, #tpu.memory_space<vmem>>, %arg8: memref<4x1xf32, #tpu.memory_space<vmem>>, %arg9: memref<1x4x256xf32, #tpu.memory_space<vmem>>) attributes {dimension_semantics = [#tpu.dimension_semantics<parallel>], iteration_bounds = array<i64: 2>, scalar_prefetch = 0 : i64, scratch_operands = 0 : i64, tpu.core_type = #tpu.core_type<tc>, window_params = [{transform_indices = @transform_0, window_bounds = array<i64: 2>}, {transform_indices = @transform_1, window_bounds = array<i64: 2>}, {transform_indices = @transform_2, window_bounds = array<i64: 1, 4, 256>}, {transform_indices = @transform_3, window_bounds = array<i64: 1, 4, 256>}, {pipeline_mode = #tpu.pipeline_mode<synchronous>, transform_indices = @transform_4, window_bounds = array<i64: 32, 4>}, {transform_indices = @transform_5, window_bounds = array<i64: 1, 32, 1>}, {pipeline_mode = #tpu.pipeline_mode<synchronous>, transform_indices = @transform_6, window_bounds = array<i64: 4, 32>}, {pipeline_mode = #tpu.pipeline_mode<synchronous>, transform_indices = @transform_7, window_bounds = array<i64: 4, 1>}, {transform_indices = @transform_8, window_bounds = array<i64: 1, 4, 256>}]} {
    %cst = arith.constant 0.000000e+00 : f32
    %0 = vector.broadcast %cst : f32 to vector<4x256xf32>
    %c0_i32 = arith.constant 0 : i32
    %c1_i32 = arith.constant 1 : i32
    %1 = arith.muli %arg0, %c1_i32 : i32
    %2 = arith.addi %1, %c0_i32 : i32
    %3 = arith.index_cast %c0_i32 : i32 to index
    %c0 = arith.constant 0 : index
    %c0_0 = arith.constant 0 : index
    %4 = vector.load %arg3[%3, %c0, %c0_0] : memref<1x4x256xbf16, #tpu.memory_space<vmem>>, vector<1x4x256xbf16>
    %5 = vector.shape_cast %4 : vector<1x4x256xbf16> to vector<4x256xbf16>
    %6 = arith.extf %5 : vector<4x256xbf16> to vector<4x256xf32>
    %7 = arith.index_cast %c0_i32 : i32 to index
    %c0_1 = arith.constant 0 : index
    %c0_2 = arith.constant 0 : index
    %8 = vector.load %arg4[%7, %c0_1, %c0_2] : memref<1x4x256xbf16, #tpu.memory_space<vmem>>, vector<1x4x256xbf16>
    %9 = vector.shape_cast %8 : vector<1x4x256xbf16> to vector<4x256xbf16>
    %10 = arith.extf %9 : vector<4x256xbf16> to vector<4x256xf32>
    %11 = arith.index_cast %2 : i32 to index
    %12 = memref.load %arg1[%11] : memref<2xf32, #tpu.memory_space<smem>>
    %13 = arith.index_cast %2 : i32 to index
    %14 = memref.load %arg2[%13] : memref<2xf32, #tpu.memory_space<smem>>
    %15 = vector.broadcast %12 : f32 to vector<4x256xf32>
    %16 = arith.mulf %15, %6 : vector<4x256xf32>
    %17 = vector.broadcast %14 : f32 to vector<4x256xf32>
    %18 = arith.mulf %17, %10 : vector<4x256xf32>
    %19 = arith.addf %16, %18 : vector<4x256xf32>
    %c0_3 = arith.constant 0 : index
    %c0_4 = arith.constant 0 : index
    %20 = vector.load %arg5[%c0_3, %c0_4] : memref<32x4xf32, #tpu.memory_space<vmem>>, vector<32x4xf32>
    %cst_5 = arith.constant dense<0.000000e+00> : vector<32x256xf32>
    %21 = tpu.matmul %20, %19, %cst_5 {dimension_numbers = #tpu.dot_dimension_numbers<[1], [0], [0], [1], [0, 0, 1, 1], [], []>} : vector<32x4xf32>, vector<4x256xf32>, vector<32x256xf32> -> vector<32x256xf32>
    %22 = arith.index_cast %c0_i32 : i32 to index
    %c0_6 = arith.constant 0 : index
    %c0_7 = arith.constant 0 : index
    %23 = vector.load %arg6[%22, %c0_6, %c0_7] : memref<1x32x1xf32, #tpu.memory_space<vmem>>, vector<1x32x1xf32>
    %24 = vector.shape_cast %23 : vector<1x32x1xf32> to vector<32x1xf32>
    %25 = vector.broadcast %24 : vector<32x1xf32> to vector<32x256xf32>
    %26 = arith.addf %21, %25 : vector<32x256xf32>
    %cst_8 = arith.constant 0.000000e+00 : f32
    %27 = vector.broadcast %cst_8 : f32 to vector<32x256xf32>
    %28 = arith.maximumf %26, %27 : vector<32x256xf32>
    %c0_9 = arith.constant 0 : index
    %c0_10 = arith.constant 0 : index
    %29 = vector.load %arg7[%c0_9, %c0_10] : memref<4x32xf32, #tpu.memory_space<vmem>>, vector<4x32xf32>
    %cst_11 = arith.constant dense<0.000000e+00> : vector<4x256xf32>
    %30 = tpu.matmul %29, %28, %cst_11 {dimension_numbers = #tpu.dot_dimension_numbers<[1], [0], [0], [1], [0, 0, 1, 1], [], []>} : vector<4x32xf32>, vector<32x256xf32>, vector<4x256xf32> -> vector<4x256xf32>
    %c0_12 = arith.constant 0 : index
    %c0_13 = arith.constant 0 : index
    %31 = vector.load %arg8[%c0_12, %c0_13] : memref<4x1xf32, #tpu.memory_space<vmem>>, vector<4x1xf32>
    %32 = vector.broadcast %31 : vector<4x1xf32> to vector<4x256xf32>
    %33 = arith.addf %30, %32 : vector<4x256xf32>
    %34 = arith.subf %33, %10 : vector<4x256xf32>
    %35 = arith.mulf %34, %34 : vector<4x256xf32>
    %36 = arith.addf %0, %35 : vector<4x256xf32>
    %c1_i32_14 = arith.constant 1 : i32
    %c0_15 = arith.constant 0 : index
    %c0_16 = arith.constant 0 : index
    %c0_17 = arith.constant 0 : index
    %37 = vector.load %arg9[%c0_15, %c0_16, %c0_17] : memref<1x4x256xf32, #tpu.memory_space<vmem>>, vector<1x4x256xf32>
    %38 = vector.shape_cast %37 : vector<1x4x256xf32> to vector<4x256xf32>
    %39 = vector.shape_cast %36 : vector<4x256xf32> to vector<1x4x256xf32>
    tpu.vector_store %arg9[%c0_15, %c0_16, %c0_17], %39 {strides = array<i32>} : memref<1x4x256xf32, #tpu.memory_space<vmem>>, vector<1x4x256xf32>,
    return
  }
  func.func @transform_0(%arg0: i32) -> i32 {
    %c0_i32 = arith.constant 0 : i32
    %c0_i32_0 = arith.constant 0 : i32
    return %c0_i32 : i32
  }
  func.func @transform_1(%arg0: i32) -> i32 {
    %c0_i32 = arith.constant 0 : i32
    %c0_i32_0 = arith.constant 0 : i32
    return %c0_i32 : i32
  }
  func.func @transform_2(%arg0: i32) -> (i32, i32, i32) {
    %c0_i32 = arith.constant 0 : i32
    %c0_i32_0 = arith.constant 0 : i32
    %c0_i32_1 = arith.constant 0 : i32
    return %arg0, %c0_i32, %c0_i32_0 : i32, i32, i32
  }
  func.func @transform_3(%arg0: i32) -> (i32, i32, i32) {
    %c0_i32 = arith.constant 0 : i32
    %c0_i32_0 = arith.constant 0 : i32
    %c0_i32_1 = arith.constant 0 : i32
    return %arg0, %c0_i32, %c0_i32_0 : i32, i32, i32
  }
  func.func @transform_4(%arg0: i32) -> (i32, i32) {
    %c0_i32 = arith.constant 0 : i32
    %c0_i32_0 = arith.constant 0 : i32
    %c0_i32_1 = arith.constant 0 : i32
    return %c0_i32, %c0_i32_0 : i32, i32
  }
  func.func @transform_5(%arg0: i32) -> (i32, i32, i32) {
    %c0_i32 = arith.constant 0 : i32
    %c0_i32_0 = arith.constant 0 : i32
    %c0_i32_1 = arith.constant 0 : i32
    return %arg0, %c0_i32, %c0_i32_0 : i32, i32, i32
  }
  func.func @transform_6(%arg0: i32) -> (i32, i32) {
    %c0_i32 = arith.constant 0 : i32
    %c0_i32_0 = arith.constant 0 : i32
    %c0_i32_1 = arith.constant 0 : i32
    return %c0_i32, %c0_i32_0 : i32, i32
  }
  func.func @transform_7(%arg0: i32) -> (i32, i32) {
    %c0_i32 = arith.constant 0 : i32
    %c0_i32_0 = arith.constant 0 : i32
    %c0_i32_1 = arith.constant 0 : i32
    return %c0_i32, %c0_i32_0 : i32, i32
  }
  func.func @transform_8(%arg0: i32) -> (i32, i32, i32) {
    %c0_i32 = arith.constant 0 : i32
    %c0_i32_0 = arith.constant 0 : i32
    %c0_i32_1 = arith.constant 0 : i32
    return %arg0, %c0_i32, %c0_i32_0 : i32, i32, i32
  }
}

</mosaic_0001>

<bundles_post_ra>
// kernel: tpu_custom_call.1
= control target key start
LH: loop header
LB: loop body
LE: loop exit
PB: predicated region body
PF: predicated region fallthrough
CT: control target
= control target key end

     0   :  { %s1165_s0 = inlined_call_operand.vmem [shape: f32[2], index: 0, kind: input, shape index: {}]   ;;  %s1166_s1 = inlined_call_operand.vmem [shape: f32[2], index: 1, kind: input, shape index: {}]   ;;  %s1167_s2 = inlined_call_operand.vmem [shape: bf16[2,4,256], index: 2, kind: input, shape index: {}]   ;;  %s1168_s3 = inlined_call_operand.vmem [shape: bf16[2,4,256], index: 3, kind: input, shape index: {}]   ;;  %s1169_s4 = inlined_call_operand.vmem [shape: f32[32,4], index: 4, kind: input, shape index: {}]   ;;  %s1170_s5 = inlined_call_operand.vmem [shape: f32[2,32,1], index: 5, kind: input, shape index: {}]   ;;  %s1171_s6 = inlined_call_operand.vmem [shape: f32[4,32], index: 6, kind: input, shape index: {}]   ;;  %s1172_s7 = inlined_call_operand.vmem [shape: f32[4,1], index: 7, kind: input, shape index: {}]   ;;  %s1173_s8 = inlined_call_operand.hbm [shape: f32[2,4,256], index: 8, kind: output, shape index: {}]  }
   0x1   :  { %1177 = sst [smem:[#allocation11_spill]] %s1165_s0 }
   0x2   :  { %13 = vsyncpa [#allocation4], 0 }
   0x3   :  { %14 = vsyncpa [#allocation6], 0 }
   0x4   :  { %15 = vsyncpa [#allocation3], 0 }
   0x5   :  { %17 = vsyncpa [#allocation3 + $0x1], 0  ;;  %s998_s27 = smov 0   ;;  %s1000_s28 = smov 0  }
   0x6   :  { %s1002_s29 = smov 0   ;;  %s1004_s30 = smov 0  }
   0x7 LB: > { %s1019_s9 = sadd.s32 4294967295, %s946_s30   ;;  %s743_s10 = sadd.s32 4294967294, %s946_s30   ;;  %s946_s30 = sphi %s1004_s30, %s1193_s30   ;;  %s942_s29 = sphi %s1002_s29, %s1192_s29   ;;  %s938_s28 = sphi %s1000_s28, %s1191_s28   ;;  %s934_s27 = sphi %s998_s27, %s1190_s27  }
   0x8   : > { %s1023_s11 = sadd.s32 1, %s946_s30   ;;  %s213_s12 = sadd.s32 1, %s942_s29 }
   0x9   : > { %s210_s13 = ssub.s32 %s946_s30, %s1023_s11  ;;  %p223_p0 = scmp.ne.s32.totalorder %s942_s29, %s938_s28 }
   0xa   : > { %p211_p1 = scmp.eq.s32.totalorder %s210_s13, 0  ;;  %p224_p2 = scmp.eq.s32.totalorder %s1019_s9, 1 }
   0xb   : > { %p229_p3 = scmp.ne.s32.totalorder %s938_s28, %s934_s27  ;;  %p230_p4 = scmp.eq.s32.totalorder %s743_s10, 1 }
   0xc   : > { %s1034_s14 = scalar_select %p211_p1, %s942_s29, %s213_s12  }
   0xd   : > { %p1036_p5 = por %p224_p2, %p223_p0  ;;  %p1040_p6 = por %p230_p4, %p229_p3 }
   0xe   : > { %p744_p7 = scmp.ge.s32.totalorder %s946_s30, 1  ;;  %p237_p8 = scmp.lt.s32.totalorder %s946_s30, 3 }
   0xf   : > { %s1178_s15 = scalar_select %p1036_p5, 1, 0 }
  0x10   : > { %s1179_s16 = scalar_select %p1040_p6, 1, 0 }
  0x11   : > { %p1174_p9 = scmp.eq.s32.totalorder %s1019_s9, 0  ;;  %p1047_p10 = pnand %p744_p7, %p237_p8 }
  0x12   : > { %s1181_s0 = sld [smem:[#allocation11_spill]]  ;;  %s261_s23 = sshll.u32 %s1166_s1, 4  ;;  %s262_s23 = int_to_ptr.vmem [resolvable:$true] %s261_s23 }
  0x13   : > { %s1180_s17 = scalar_select %p1047_p10, 1, 0 }
  0x14   : > { %p792_p11 = pneg %p1047_p10 }
  0x16   : > { %p1061_p12 = pnand %p1174_p9, %p792_p11 }
  0x18   : > { %s250_s20 = sshll.u32 %s1181_s0, 4  ;;  %p848_p0 = pneg %p1061_p12  ;;  %s251_s20 = int_to_ptr.vmem [resolvable:$true] %s250_s20 }
  0x19   : > { %s846_s25 = scalar_lea.vmem %s251_s20, 16  ;;  %p854_p3 = scmp.lt.s32.totalorder %s251_s20, %s251_s20 }
  0x1a   : > { %p847_p13 = scmp.ne.s32.totalorder %s251_s20, %s846_s25  ;;  %p855_p4 = scmp.lt.s32.totalorder %s846_s25, %s846_s25 }
  0x1c   : > { %p849_p1 = pnand %p848_p0, %p847_p13  ;;  %p856_p7 = por %p855_p4, %p854_p3 }
  0x1e   : > { %p850_p2 = pneg %p849_p1 }
  0x20   : > { %p857_p8 = pnand %p856_p7, %p850_p2 }
  0x22   : > { %860 = shalt.err (!%p857_p8)
}
  0x23   : > { %s948_s26 = smov [#allocation2]   ;;  %s861_s10 = scalar_lea.vmem %s262_s23, 16 }
  0x24   : > { %795 = dma.vmem_to_smem (!%p1061_p12), %s251_s20, 16, %s948_s26, [#allocation4]  }
  0x25   : > { %p862_p11 = scmp.ne.s32.totalorder %s262_s23, %s861_s10  ;;  %p869_p5 = scmp.lt.s32.totalorder %s262_s23, %s262_s23 }
  0x26   : > { %p870_p10 = scmp.lt.s32.totalorder %s861_s10, %s861_s10 }
  0x27   : > { %p864_p9 = pnand %p862_p11, %p848_p0 }
  0x28   : > { %p871_p13 = por %p870_p10, %p869_p5 }
  0x29   : > { %p865_p6 = pneg %p864_p9 }
  0x2b   : > { %p872_p1 = pnand %p871_p13, %p865_p6 }
  0x2d   : > { %875 = shalt.err (!%p872_p1)
}
  0x2e   : > { %s949_s12 = smov [#allocation5]   ;;  %p1183_p2 = scmp.ne.s32.totalorder %s1180_s17, 0 }
  0x2f   : > { %798 = dma.vmem_to_smem (!%p1061_p12), %s262_s23, 16, %s949_s12, [#allocation6]  }
  0x30   : > { %307 = sbr.rel (%p1183_p2) target bundleno = 550 (0x226), region = 52  ;;  %p1184_p3 = scmp.eq.s32.totalorder (!%p1183_p2), %s1019_s9, 0 }
  0x37   : > { %921 = dma.done.wait (%p1184_p3), [#allocation4], 16   ;;  %p1185_p4 = pmov %p1184_p3 }
  0x38   : > { %p1186_p9 = pmov %p1184_p3 }
  0x39   : > { %923 = vsyncadd (%p1185_p4), [#allocation4], 4294967280 }
  0x3a   : > { %925 = dma.done.wait (%p1186_p9), [#allocation6], 16   ;;  %p1187_p5 = pmov %p1184_p3 }
  0x3c   : > { %927 = vsyncadd (%p1187_p5), [#allocation6], 4294967280 }
  0x3d   : > { %317 = sfence }
  0x3e   : > { %p356_p6 = scmp.lt.s32.totalorder %s1019_s9, 1  ;;  %s375_s13 = sld [smem:[#allocation2 + %s1019_s9]]  ;;  %v950_v0 = vmov 0.0   ;;  %v951_v1 = vmov 0   ;;  %vm425_vm0 = vcmask 1043456   ;;  %v382_v17 = vld [vmem:[%s1169_s4] sm:$0xff] }
  0x3f   : > { %s376_s17 = sld [smem:[#allocation5 + %s1019_s9]]  ;;  %494 = vmatprep.mubr.f32.mxu0 %v950_v0  ;;  %602 = vmatprep.mubr.f32.mxu1 %v950_v0  ;;  %v528_v16 = vld [vmem:[%s1172_s7] sm:$0xf]  ;;  %vm412_vm1 = vcmask 31744   ;;  %v383_v18 = vld [vmem:[%s1169_s4 + $0x8] sm:$0xff]  ;;  %v384_v19 = vld [vmem:[%s1169_s4 + $0x10] sm:$0xff] }
  0x40   : > { %s357_s18 = scalar_select %p356_p6, %s1019_s9, 1  ;;  %844 = vset.pattern.permute.xlu0 %v951_v1  ;;  %845 = vset.pattern.permute.xlu1 %v951_v1  ;;  %v385_v20 = vld [vmem:[%s1169_s4 + $0x18] sm:$0xff]  ;;  %v527_v53 = vld [vmem:[%s1171_s6] sm:$0xf]  ;;  %vm534_vm2 = vcmask 261120  }
  0x41   : > { %s353_s10 = sand.u32 1, %s938_s28   ;;  %p1188_p12 = scmp.ne.s32.totalorder %s1178_s15, 0 }
  0x42   : > { %s770_s19 = sshll.u32 %s357_s18, 2  ;;  %s772_s20 = sshll.u32 %s357_s18, 5 }
  0x43   : > { %s360_s23 = scalar_lea.vmem %s1167_s2, %s770_s19  ;;  %s365_s26 = scalar_lea.vmem %s1168_s3, %s770_s19 }
  0x44   : > { %v371_v2 = vld [vmem:[%s360_s23] sm:$0xf]  ;;  %v377_v4 = vstv %s375_s13  ;;  %s370_s0 = scalar_lea.vmem %s1170_s5, %s772_s20  ;;  %s751_s12 = sshll.u32 %s353_s10, 3 }
  0x45   : > { %v373_v3 = vld [vmem:[%s365_s26] sm:$0xf]  ;;  %v372_v5 = vunpack.c.l.bf16 %v371_v2  ;;  %v379_v7 = vstv %s376_s17  ;;  %v388_v9 = vld [vmem:[%s370_s0 + $0x10] sm:$0xff]  ;;  %v387_v12 = vld [vmem:[%s370_s0 + $0x8] sm:$0xff]  ;;  %s773_s13 = sshll.u32 %s1019_s9, 7  ;;  %s355_s18 = scalar_lea.vmem [#allocation7], %s751_s12 }
  0x46   : > { %v1094_v6 = vunpack.c.l.bf16 %v373_v3  ;;  %v386_v8 = vld [vmem:[%s370_s0] sm:$0xff]  ;;  %402 = vperm.xlu1 %845, %v388_v9   ;;  %v389_v13 = vld [vmem:[%s370_s0 + $0x18] sm:$0xff]  ;;  %s638_s19 = sshll.u32 %s355_s18, 4  ;;  %s1123_s20 = scalar_lea.hbm %s1173_s8, %s773_s13  ;;  %s1125_s19 = int_to_ptr.vmem [resolvable:$true] %s638_s19 }
  0x47   : > { %392 = vperm.xlu0 %844, %v386_v8   ;;  %v378_v10 = vmul.f32 %v377_v4, %v372_v5  ;;  %s624_s21 = scalar_lea.sflag [#allocation3], %s353_s10  ;;  %s876_s22 = scalar_lea.vmem %s1125_s19, 128 }
  0x48   : > { %v380_v11 = vmul.f32 %v379_v7, %v1094_v6  ;;  %v610_v56 = vcombine.high %v1094_v6, %v1094_v6  ;;  %p877_p10 = scmp.ne.s32.totalorder %s1125_s19, %s876_s22  ;;  %s952_s9 = smov [#allocation7]  }
  0x49   : > { %s880_s23 = sshll.u32 %s952_s9, 4  ;;  %s881_s23 = int_to_ptr.vmem [resolvable:$false] %s880_s23 }
  0x4a   : > { %v381_v14 = vadd.f32 %v380_v11, %v378_v10  ;;  %407 = vperm.xlu1 %845, %v389_v13   ;;  %p878_p0 = pnand %p877_p10, %p1188_p12  ;;  %s882_s24 = scalar_lea.vmem %s881_s23, 256 }
  0x4b   : > { %397 = vperm.xlu0 %844, %v387_v12   ;;  %p883_p8 = scmp.lt.s32.totalorder %s1125_s19, %s881_s23  ;;  %p884_p11 = scmp.lt.s32.totalorder %s882_s24, %s876_s22 }
  0x4c   : > { %v411_v15 = vcombine.high %v381_v14, %v381_v14  ;;  %p879_p7 = pneg %p878_p0 }
  0x4d   : > { %p885_p13 = por %p884_p11, %p883_p8 }
  0x4e   : > { %758 = vmatprep.subr.msk.mxu0 %vm425_vm0, %v411_v15 }
  0x4f   : > { %759 = vmatpush1.msk.msra.mxu0 %vm425_vm0, %v381_v14  ;;  %531 = vperm.xlu0 %844, %v528_v16   ;;  %p886_p1 = pnand %p885_p13, %p879_p7 }
  0x50   : > { %760 = vmatmul.mubr.msk.f32.vlgmr.msra.gmra.mrb[0].mxu0 %vm412_vm1, %v382_v17 }
  0x51   : > { %500 = vmatprep.mubr.f32.mxu0 %v950_v0 }
  0x54   : > { %761 = vmatmul.mubr.msk.f32.gmra.mrb[2].mxu0 %vm412_vm1, %v383_v18 }
  0x55   : > { %506 = vmatprep.mubr.f32.mxu0 %v950_v0 }
  0x58   : > { %762 = vmatmul.mubr.msk.f32.gmra.mrb[4].mxu0 %vm412_vm1, %v384_v19 }
  0x59   : > { %512 = vmatprep.mubr.f32.mxu0 %v950_v0 }
  0x5c   : > { %763 = vmatmul.mubr.msk.f32.gmra.mrb[6].mxu0 %vm412_vm1, %v385_v20 }
  0xc5   : > { %v403_v30 = vpop.permute.xlu1 %402 }
  0xc6   : > { %v393_v21 = vpop.permute.xlu0 %392 }
  0xc9   : > { %v408_v41 = vpop.permute.xlu1 %407 }
  0xca   : > { %v398_v25 = vpop.permute.xlu0 %397 }
  0xce   : > { %v532_v54 = vpop.permute.xlu0 %531 }
 0x123   : > { %v496_v22 = vpop.f32.mrb[0].mxu0 }
 0x124   : > { %v498_v23 = vpop.f32.mrb[1].mxu0  ;;  %v497_v24 = vadd.f32 %v496_v22, %v393_v21 }
 0x125   : > { %v499_v26 = vadd.f32 %v498_v23, %v393_v21 }
 0x126   : > { %v519_v32 = vmax.f32 %v497_v24, 0.0 }
 0x127   : > { %v502_v27 = vpop.f32.mrb[2].mxu0  ;;  %v520_v34 = vmax.f32 %v499_v26, 0.0 }
 0x128   : > { %v503_v28 = vadd.f32 %v502_v27, %v398_v25  ;;  %v504_v29 = vpop.f32.mrb[3].mxu0 }
 0x129   : > { %v505_v31 = vadd.f32 %v504_v29, %v398_v25 }
 0x12a   : > { %v521_v33 = vmax.f32 %v503_v28, 0.0 }
 0x12b   : > { %v522_v35 = vmax.f32 %v505_v31, 0.0  ;;  %v508_v36 = vpop.f32.mrb[4].mxu0 }
 0x12c   : > { %v510_v37 = vpop.f32.mrb[5].mxu0  ;;  %v776_v38 = vpack.c.bf16 %v521_v33, %v519_v32  ;;  %v509_v40 = vadd.f32 %v508_v36, %v403_v30 }
 0x12d   : > { %v774_v39 = vpack.c.bf16 %v522_v35, %v520_v34  ;;  %v511_v42 = vadd.f32 %v510_v37, %v403_v30 }
 0x12e   : > { %v523_v47 = vmax.f32 %v509_v40, 0.0 }
 0x12f   : > { %v514_v43 = vpop.f32.mrb[6].mxu0  ;;  %775 = vmatprep.subr.bf16.mxu1 %v774_v39  ;;  %v524_v49 = vmax.f32 %v511_v42, 0.0 }
 0x130   : > { %v515_v44 = vadd.f32 %v514_v43, %v408_v41  ;;  %v516_v45 = vpop.f32.mrb[7].mxu0  ;;  %777 = vmatpush1.bf16.msra.mxu1 %v776_v38 }
 0x131   : > { %v517_v46 = vadd.f32 %v516_v45, %v408_v41 }
 0x132   : > { %v525_v48 = vmax.f32 %v515_v44, 0.0 }
 0x133   : > { %v526_v50 = vmax.f32 %v517_v46, 0.0 }
 0x134   : > { %v780_v51 = vpack.c.bf16 %v525_v48, %v523_v47 }
 0x135   : > { %v778_v52 = vpack.c.bf16 %v526_v50, %v524_v49 }
 0x137   : > { %779 = vmatprep.subr.bf16.mxu1 %v778_v52 }
 0x138   : > { %781 = vmatpush1.bf16.msra.mxu1 %v780_v51 }
 0x13b   : > { %764 = vmatmul.mubr.msk.f32.vlgmr.msra.gmra.mrb[0].mxu1 %vm534_vm2, %v527_v53 }
 0x20e   : > { %v604_v55 = vpop.f32.mrb[0].mxu1 }
 0x20f   : > { %v605_v57 = vadd.f32 %v604_v55, %v532_v54  ;;  %v606_v58 = vpop.f32.mrb[1].mxu1 }
 0x210   : > { %v607_v59 = vadd.f32 %v606_v58, %v532_v54 }
 0x211   : > { %v612_v60 = vsub.f32 %v605_v57, %v1094_v6 }
 0x212   : > { %v613_v61 = vsub.f32 %v607_v59, %v610_v56 }
 0x213   : > { %v614_v62 = vmul.f32 %v612_v60, %v612_v60 }
 0x214   : > { %v615_v63 = vmul.f32 %v613_v61, %v613_v61 }
 0x216   : > { %v620_v0 = vcombine.low %v614_v62, %v615_v63 }
 0x218   : > { %622 = vst [vmem:[%s355_s18] sm:$0xff] %v620_v0 }
 0x219   : > { %889 = shalt.err (!%p886_p1)
}
 0x21a   : > { %s890_s25 = scalar_lea.hbm %s1123_s20, 128  ;;  %s894_s12 = scalar_lea.hbm %s1173_s8, 256 }
 0x21b   : > { %p891_p2 = scmp.ne.s32.totalorder %s1123_s20, %s890_s25  ;;  %p895_p9 = scmp.lt.u32.totalorder %s1123_s20, %s1173_s8 }
 0x21c   : > { %p896_p5 = scmp.lt.u32.totalorder %s894_s12, %s890_s25  ;;  %p898_p10 = scmp.lt.u32.totalorder %s890_s25, %s1123_s20 }
 0x21d   : > { %p892_p3 = pnand %p891_p2, %p1188_p12 }
 0x21e   : > { %p897_p6 = por %p896_p5, %p895_p9 }
 0x21f   : > { %p893_p4 = pneg %p892_p3 }
 0x220   : > { %p899_p0 = por %p898_p10, %p897_p6 }
 0x222   : > { %p900_p7 = pnand %p899_p0, %p893_p4 }
 0x224   : > { %903 = shalt.err (!%p900_p7)
}
 0x225   : > { %790 = dma.vmem_to_hbm [thread:$0]  (%p1188_p12), %s1125_s19, 128, %s1123_s20, %s624_s21  }
 0x226 PF: > { %p807_p8 = scmp.ge.s32.totalorder %s946_s30, 2  ;;  %s650_s17 = sand.u32 1, %s934_s27  }
 0x227   : > { %p1189_p11 = scmp.ne.s32.totalorder %s1179_s16, 0  ;;  %s651_s0 = scalar_lea.sflag [#allocation3], %s650_s17 }
 0x229   : > { %p800_p13 = pnand %p807_p8, %p1189_p11 }
 0x22b   : > { %929 = dma.done.wait (!%p800_p13), %s651_s0, 128  }
 0x22c   : > { %931 = vsyncadd (!%p800_p13), %s651_s0, 4294967168  ;;  %p20_p1 = scmp.ge.s32.totalorder %s1023_s11, 4   ;;  %s1190_s27 = smov %s938_s28 }
 0x22d   : > { %s1191_s28 = smov %s942_s29  ;;  %s1192_s29 = smov %s1034_s14 }
 0x22e   : > { %s1193_s30 = smov %s1023_s11  ;;  %22 = sbr.rel (!%p20_p1) target bundleno = 7 (0x7), region = 102 }
 0x235   :  { %656 = vsyncpa [#allocation3], 1 }
 0x236   :  { %658 = vsyncpa [#allocation3 + $0x1], 1 }
 0x237   :  { %659 = vsyncpa [#allocation4], 1 }
 0x238   :  { %661 = vsyncpa [#allocation4 + $0x1], 1 }
 0x239   :  { %662 = vsyncpa [#allocation6], 1 }

</bundles_post_ra>
